<compile_context>
chip_gen: v7x
topology: tpu7x:2x2x1
jax: 0.10.0
libtpu: 0.0.40
codegen_flags: <defaults>
</compile_context>

<pallas_src>
import functools

import jax
import jax.numpy as jnp
from jax.experimental import pallas as pl
from jax.experimental.pallas import tpu as pltpu


def _round_up(x, m):
    return (x + m - 1) // m * m


_ACTIVATIONS = {
    "relu": lambda x: jnp.maximum(x, 0.0),
    "leaky_relu": jax.nn.leaky_relu,
    "elu": jax.nn.elu,
    "silu": jax.nn.silu,
    "gelu": jax.nn.gelu,
    "tanh": jnp.tanh,
    "sigmoid": jax.nn.sigmoid,
    "identity": lambda x: x,
}


# ----------------------------------------------------------------------------
# Fused kernel: all layers of the MLP for one batch tile.
#   layer 0:      y = x @ W0 + b0 + noise0                 (not collected)
#   layer i>0:    y = act(y_prev) @ Wi + bi + noise_i      (collected)
# Matmuls run in bf16 (MXU-native) with f32 accumulation; everything after the
# matmul (bias, noise, activation) stays f32 on the VPU/EUP.
# ----------------------------------------------------------------------------
def _make_mlp_kernel(n_layers, has_noise, noise_std, act_fn, compute_dtype):
    step = 3 if has_noise else 2

    def kernel(*refs):
        x_ref = refs[0]
        layer_refs = refs[1:1 + n_layers * step]
        out_refs = refs[1 + n_layers * step:]

        x = x_ref[...]                                   # (tile_b, Pin0) f32
        for li in range(n_layers):                       # static unroll
            w_ref = layer_refs[li * step + 0]
            b_ref = layer_refs[li * step + 1]
            if li > 0:
                x = act_fn(x)                            # activation in f32
            y = jnp.dot(x.astype(compute_dtype), w_ref[...],
                        preferred_element_type=jnp.float32)
            y = y + b_ref[...]                           # f32 bias
            if has_noise:
                y = y + noise_std * layer_refs[li * step + 2][...]
            if li > 0:
                out_refs[li - 1][...] = y.astype(out_refs[li - 1].dtype)
            x = y

    return kernel


def _resident_spec(block_shape, index_map):
    """Constant-index operand: request single buffering (halves resident VMEM)."""
    try:
        return pl.BlockSpec(block_shape, index_map, pipeline_mode=pl.Buffered(1))
    except (AttributeError, TypeError):
        # Older JAX without pipeline_mode / Buffered: fall back to default.
        return pl.BlockSpec(block_shape, index_map)


# ----------------------------------------------------------------------------
# One-time host-side preparation: per-layer lane-dense padding, bf16 weights.
# ----------------------------------------------------------------------------
def prepare_mlp_params(weights, biases, compute_dtype=jnp.bfloat16):
    """weights[i]: (in_i, out_i) f32, biases[i]: (1, out_i) f32."""
    in_dims = [int(w.shape[0]) for w in weights]
    out_dims = [int(w.shape[1]) for w in weights]
    pins = [_round_up(d, 128) for d in in_dims]
    pouts = [_round_up(d, 128) for d in out_dims]
    for li in range(len(weights) - 1):
        assert out_dims[li] == in_dims[li + 1]

    # Padded weight rows are zero, so garbage in padded activation lanes can
    # never propagate into real output columns.
    w_p = [jnp.pad(w.astype(compute_dtype),
                   ((0, pi - w.shape[0]), (0, po - w.shape[1])))
           for w, pi, po in zip(weights, pins, pouts)]
    b_p = [jnp.pad(jnp.reshape(b.astype(jnp.float32), (1, -1)),
                   ((0, 0), (0, po - b.shape[-1])))
           for b, po in zip(biases, pouts)]
    return dict(w=w_p, b=b_p, in_dims=in_dims, out_dims=out_dims,
                pins=pins, pouts=pouts, compute_dtype=compute_dtype)


# ----------------------------------------------------------------------------
# Wrapper: size the batch tile against the VMEM budget, build specs, run one
# fused pallas_call, slice the padded outputs back to real shapes.
# ----------------------------------------------------------------------------
def mlp_forward(x, params, *, noise_std=0.01, rng_key=None,
                max_tile_b=512, activation="relu"):
    """Forward pass of MLP.forward; returns the list of n_hid collected outputs."""
    w_p, b_p = params["w"], params["b"]
    pins, pouts = params["pins"], params["pouts"]
    in_dims, out_dims = params["in_dims"], params["out_dims"]
    compute_dtype = params["compute_dtype"]
    n_layers = len(w_p)
    n_hid = n_layers - 1
    assert n_hid >= 1
    B = x.shape[0]
    assert x.shape[1] == in_dims[0]
    has_noise = noise_std != 0.0

    # Per-generation VMEM budget (v7x has only 64 MiB per TensorCore).
    try:
        vmem_cap = int(pltpu.get_tpu_info().vmem_capacity_bytes)
    except Exception:
        vmem_cap = 64 * 1024 * 1024
    budget = int(vmem_cap * 0.7)

    w_item = jnp.dtype(compute_dtype).itemsize

    def vmem_needed(tb):
        wb = sum(pi * po * w_item for pi, po in zip(pins, pouts))   # Buffered(1)
        bb = sum(po * 4 for po in pouts)                            # Buffered(1)
        xb = 2 * tb * pins[0] * 4                                   # double-buffered
        nb = 2 * sum(tb * po * 4 for po in pouts) if has_noise else 0
        ob = 2 * sum(tb * po * 4 for po in pouts[1:])
        live = 2 * tb * max(pouts) * 4                              # live activation
        return wb + bb + xb + nb + ob + live

    tile_b = _round_up(min(max_tile_b, _round_up(B, 8)), 8)
    while tile_b > 8 and vmem_needed(tile_b) > budget:
        tile_b = max(8, _round_up(tile_b // 2, 8))
    # TODO(synk): if the (bf16) weights alone exceed the budget (very large
    # dims on v7x), fall back to a per-layer / K-tiled kernel instead of the
    # fully fused, weight-resident path.

    Bp = _round_up(B, tile_b)
    grid = (Bp // tile_b,)

    x_p = jnp.pad(x.astype(jnp.float32),
                  ((0, Bp - B), (0, pins[0] - in_dims[0])))

    inputs = [x_p]
    in_specs = [pl.BlockSpec((tile_b, pins[0]), lambda i: (i, 0))]

    if has_noise:
        if rng_key is None:
            rng_key = jax.random.PRNGKey(0)
        noise_keys = jax.random.split(rng_key, n_layers)

    for li in range(n_layers):
        inputs.append(w_p[li])
        in_specs.append(_resident_spec((pins[li], pouts[li]), lambda i: (0, 0)))
        inputs.append(b_p[li])
        in_specs.append(_resident_spec((1, pouts[li]), lambda i: (0, 0)))
        if has_noise:
            noise = jax.random.normal(noise_keys[li], (Bp, pouts[li]), jnp.float32)
            inputs.append(noise)
            in_specs.append(pl.BlockSpec((tile_b, pouts[li]), lambda i: (i, 0)))

    out_shape = tuple(jax.ShapeDtypeStruct((Bp, pouts[li]), jnp.float32)
                      for li in range(1, n_layers))
    out_specs = tuple(pl.BlockSpec((tile_b, pouts[li]), lambda i: (i, 0))
                      for li in range(1, n_layers))

    vmem_limit = int(min(vmem_cap * 0.9,
                         max(vmem_needed(tile_b) * 2, 32 * 1024 * 1024)))

    kernel = _make_mlp_kernel(n_layers, has_noise, float(noise_std),
                              _ACTIVATIONS[activation], compute_dtype)

    outs = pl.pallas_call(
        kernel,
        out_shape=out_shape,
        grid=grid,
        in_specs=in_specs,
        out_specs=out_specs,
        compiler_params=pltpu.CompilerParams(
            dimension_semantics=("parallel",),
            vmem_limit_bytes=vmem_limit),
    )(*inputs)

    outs = list(outs) if isinstance(outs, (tuple, list)) else [outs]
    return [o[:B, :out_dims[li]] for o, li in zip(outs, range(1, n_layers))]


# ----------------------------------------------------------------------------
# Parameter construction (deterministic, mirrors MLP.__init__/reset_parameters)
# Weights are stored pre-transposed as (in_dim, out_dim).
# ----------------------------------------------------------------------------
def init_mlp_params(key, n_hid, dim, in_dim, out_dim,
                    init_scale=1.0, dropout=0.1):
    in_dims = [in_dim] + n_hid * [dim]
    out_dims = n_hid * [dim] + [out_dim]
    weights, biases = [], []
    n_layers = len(in_dims)
    for li, (i, o) in enumerate(zip(in_dims, out_dims)):
        key, kw, kb, km = jax.random.split(key, 4)
        # nn.Linear default init: U(-1/sqrt(in), 1/sqrt(in)) for weight & bias.
        bound = 1.0 / float(i) ** 0.5
        w = jax.random.uniform(kw, (i, o), jnp.float32, -bound, bound)
        b = jax.random.uniform(kb, (1, o), jnp.float32, -bound, bound)
        # reset_parameters(): scale + bernoulli-mask the hidden weights only.
        if dropout > 0.0 and 0 < li < n_layers - 1:
            w = w * (init_scale / (1.0 - dropout) ** 0.5)
            mask = jax.random.bernoulli(km, 1.0 - dropout, w.shape)
            w = w * mask.astype(w.dtype)
        weights.append(w)
        biases.append(b)
    return weights, biases


# Pure-JAX reference of MLP.forward with noise disabled, mirroring the
# kernel's bf16-in / f32-accumulate matmuls.
def _mlp_reference(x, weights, biases, compute_dtype=jnp.bfloat16):
    cd = compute_dtype
    h = jnp.dot(x.astype(cd), weights[0].astype(cd),
                preferred_element_type=jnp.float32) + biases[0].astype(jnp.float32)
    outs = []
    for w, b in zip(weights[1:], biases[1:]):
        a = jnp.maximum(h, 0.0)
        h = jnp.dot(a.astype(cd), w.astype(cd),
                    preferred_element_type=jnp.float32) + b.astype(jnp.float32)
        outs.append(h)
    return outs


if __name__ == "__main__":
    # Small shapes consistent with the module.
    n_hid = 2
    dim = 32
    in_dim = 48
    out_dim = 24
    batch = 8

    key = jax.random.PRNGKey(0)
    k_param, k_input, k_noise = jax.random.split(key, 3)

    weights, biases = init_mlp_params(
        k_param, n_hid, dim, in_dim, out_dim, init_scale=1.0, dropout=0.1)
    params = prepare_mlp_params(weights, biases)          # pad/cast once, reuse
    x = jax.random.normal(k_input, (batch, in_dim), jnp.float32)

    # Numerics check with noise disabled (forward pass is then deterministic).
    outs_nonoise = mlp_forward(x, params, noise_std=0.0)
    outs_nonoise = [jax.block_until_ready(o) for o in outs_nonoise]
    refs = _mlp_reference(x, weights, biases)
    for o, r in zip(outs_nonoise, refs):
        assert o.shape == r.shape, (o.shape, r.shape)
        assert jnp.allclose(o, r, rtol=1e-2, atol=1e-2)

    # Full forward with Gaussian noise (matches MLP.forward semantics).
    outs = mlp_forward(x, params, noise_std=0.01, rng_key=k_noise)
    outs = [jax.block_until_ready(o) for o in outs]

    assert len(outs) == n_hid
    expected = [(batch, dim)] * (n_hid - 1) + [(batch, out_dim)]
    assert all(o.shape == s for o, s in zip(outs, expected))
    assert all(bool(jnp.all(jnp.isfinite(o))) for o in outs)
    print("KERNEL_OK")
</pallas_src>

<mosaic_0001>
module attributes {stable_mosaic.version = 11 : i64} {
  func.func @kernel(%arg0: i32, %arg1: memref<8x128xf32, #tpu.memory_space<vmem>>, %arg2: memref<128x128xbf16, #tpu.memory_space<vmem>>, %arg3: memref<1x128xf32, #tpu.memory_space<vmem>>, %arg4: memref<128x128xbf16, #tpu.memory_space<vmem>>, %arg5: memref<1x128xf32, #tpu.memory_space<vmem>>, %arg6: memref<128x128xbf16, #tpu.memory_space<vmem>>, %arg7: memref<1x128xf32, #tpu.memory_space<vmem>>, %arg8: memref<8x128xf32, #tpu.memory_space<vmem>>, %arg9: memref<8x128xf32, #tpu.memory_space<vmem>>) attributes {dimension_semantics = [#tpu.dimension_semantics<parallel>], iteration_bounds = array<i64: 1>, scalar_prefetch = 0 : i64, scratch_operands = 0 : i64, tpu.core_type = #tpu.core_type<tc>, window_params = [{transform_indices = @transform_0, window_bounds = array<i64: 8, 128>}, {pipeline_mode = #tpu.pipeline_mode<synchronous>, transform_indices = @transform_1, window_bounds = array<i64: 128, 128>}, {pipeline_mode = #tpu.pipeline_mode<synchronous>, transform_indices = @transform_2, window_bounds = array<i64: 1, 128>}, {pipeline_mode = #tpu.pipeline_mode<synchronous>, transform_indices = @transform_3, window_bounds = array<i64: 128, 128>}, {pipeline_mode = #tpu.pipeline_mode<synchronous>, transform_indices = @transform_4, window_bounds = array<i64: 1, 128>}, {pipeline_mode = #tpu.pipeline_mode<synchronous>, transform_indices = @transform_5, window_bounds = array<i64: 128, 128>}, {pipeline_mode = #tpu.pipeline_mode<synchronous>, transform_indices = @transform_6, window_bounds = array<i64: 1, 128>}, {transform_indices = @transform_7, window_bounds = array<i64: 8, 128>}, {transform_indices = @transform_8, window_bounds = array<i64: 8, 128>}]} {
    %c0 = arith.constant 0 : index
    %c0_0 = arith.constant 0 : index
    %0 = vector.load %arg1[%c0, %c0_0] : memref<8x128xf32, #tpu.memory_space<vmem>>, vector<8x128xf32>
    %1 = arith.truncf %0 : vector<8x128xf32> to vector<8x128xbf16>
    %c0_1 = arith.constant 0 : index
    %c0_2 = arith.constant 0 : index
    %2 = vector.load %arg2[%c0_1, %c0_2] : memref<128x128xbf16, #tpu.memory_space<vmem>>, vector<128x128xbf16>
    %cst = arith.constant dense<0.000000e+00> : vector<8x128xf32>
    %3 = tpu.matmul %1, %2, %cst {dimension_numbers = #tpu.dot_dimension_numbers<[1], [0], [0], [1], [0, 0, 1, 1], [], []>} : vector<8x128xbf16>, vector<128x128xbf16>, vector<8x128xf32> -> vector<8x128xf32>
    %c0_3 = arith.constant 0 : index
    %c0_4 = arith.constant 0 : index
    %4 = vector.load %arg3[%c0_3, %c0_4] : memref<1x128xf32, #tpu.memory_space<vmem>>, vector<1x128xf32>
    %5 = vector.broadcast %4 : vector<1x128xf32> to vector<8x128xf32>
    %6 = arith.addf %3, %5 : vector<8x128xf32>
    %cst_5 = arith.constant 0.000000e+00 : f32
    %7 = vector.broadcast %cst_5 : f32 to vector<8x128xf32>
    %8 = arith.maximumf %6, %7 : vector<8x128xf32>
    %9 = arith.truncf %8 : vector<8x128xf32> to vector<8x128xbf16>
    %c0_6 = arith.constant 0 : index
    %c0_7 = arith.constant 0 : index
    %10 = vector.load %arg4[%c0_6, %c0_7] : memref<128x128xbf16, #tpu.memory_space<vmem>>, vector<128x128xbf16>
    %cst_8 = arith.constant dense<0.000000e+00> : vector<8x128xf32>
    %11 = tpu.matmul %9, %10, %cst_8 {dimension_numbers = #tpu.dot_dimension_numbers<[1], [0], [0], [1], [0, 0, 1, 1], [], []>} : vector<8x128xbf16>, vector<128x128xbf16>, vector<8x128xf32> -> vector<8x128xf32>
    %c0_9 = arith.constant 0 : index
    %c0_10 = arith.constant 0 : index
    %12 = vector.load %arg5[%c0_9, %c0_10] : memref<1x128xf32, #tpu.memory_space<vmem>>, vector<1x128xf32>
    %13 = vector.broadcast %12 : vector<1x128xf32> to vector<8x128xf32>
    %14 = arith.addf %11, %13 : vector<8x128xf32>
    %c0_11 = arith.constant 0 : index
    %c0_12 = arith.constant 0 : index
    %15 = vector.load %arg8[%c0_11, %c0_12] : memref<8x128xf32, #tpu.memory_space<vmem>>, vector<8x128xf32>
    tpu.vector_store %arg8[%c0_11, %c0_12], %14 {strides = array<i32>} : memref<8x128xf32, #tpu.memory_space<vmem>>, vector<8x128xf32>,
    %cst_13 = arith.constant 0.000000e+00 : f32
    %16 = vector.broadcast %cst_13 : f32 to vector<8x128xf32>
    %17 = arith.maximumf %14, %16 : vector<8x128xf32>
    %18 = arith.truncf %17 : vector<8x128xf32> to vector<8x128xbf16>
    %c0_14 = arith.constant 0 : index
    %c0_15 = arith.constant 0 : index
    %19 = vector.load %arg6[%c0_14, %c0_15] : memref<128x128xbf16, #tpu.memory_space<vmem>>, vector<128x128xbf16>
    %cst_16 = arith.constant dense<0.000000e+00> : vector<8x128xf32>
    %20 = tpu.matmul %18, %19, %cst_16 {dimension_numbers = #tpu.dot_dimension_numbers<[1], [0], [0], [1], [0, 0, 1, 1], [], []>} : vector<8x128xbf16>, vector<128x128xbf16>, vector<8x128xf32> -> vector<8x128xf32>
    %c0_17 = arith.constant 0 : index
    %c0_18 = arith.constant 0 : index
    %21 = vector.load %arg7[%c0_17, %c0_18] : memref<1x128xf32, #tpu.memory_space<vmem>>, vector<1x128xf32>
    %22 = vector.broadcast %21 : vector<1x128xf32> to vector<8x128xf32>
    %23 = arith.addf %20, %22 : vector<8x128xf32>
    %c0_19 = arith.constant 0 : index
    %c0_20 = arith.constant 0 : index
    %24 = vector.load %arg9[%c0_19, %c0_20] : memref<8x128xf32, #tpu.memory_space<vmem>>, vector<8x128xf32>
    tpu.vector_store %arg9[%c0_19, %c0_20], %23 {strides = array<i32>} : memref<8x128xf32, #tpu.memory_space<vmem>>, vector<8x128xf32>,
    return
  }
  func.func @transform_0(%arg0: i32) -> (i32, i32) {
    %c0_i32 = arith.constant 0 : i32
    %c0_i32_0 = arith.constant 0 : i32
    return %arg0, %c0_i32 : i32, i32
  }
  func.func @transform_1(%arg0: i32) -> (i32, i32) {
    %c0_i32 = arith.constant 0 : i32
    %c0_i32_0 = arith.constant 0 : i32
    %c0_i32_1 = arith.constant 0 : i32
    return %c0_i32, %c0_i32_0 : i32, i32
  }
  func.func @transform_2(%arg0: i32) -> (i32, i32) {
    %c0_i32 = arith.constant 0 : i32
    %c0_i32_0 = arith.constant 0 : i32
    %c0_i32_1 = arith.constant 0 : i32
    return %c0_i32, %c0_i32_0 : i32, i32
  }
  func.func @transform_3(%arg0: i32) -> (i32, i32) {
    %c0_i32 = arith.constant 0 : i32
    %c0_i32_0 = arith.constant 0 : i32
    %c0_i32_1 = arith.constant 0 : i32
    return %c0_i32, %c0_i32_0 : i32, i32
  }
  func.func @transform_4(%arg0: i32) -> (i32, i32) {
    %c0_i32 = arith.constant 0 : i32
    %c0_i32_0 = arith.constant 0 : i32
    %c0_i32_1 = arith.constant 0 : i32
    return %c0_i32, %c0_i32_0 : i32, i32
  }
  func.func @transform_5(%arg0: i32) -> (i32, i32) {
    %c0_i32 = arith.constant 0 : i32
    %c0_i32_0 = arith.constant 0 : i32
    %c0_i32_1 = arith.constant 0 : i32
    return %c0_i32, %c0_i32_0 : i32, i32
  }
  func.func @transform_6(%arg0: i32) -> (i32, i32) {
    %c0_i32 = arith.constant 0 : i32
    %c0_i32_0 = arith.constant 0 : i32
    %c0_i32_1 = arith.constant 0 : i32
    return %c0_i32, %c0_i32_0 : i32, i32
  }
  func.func @transform_7(%arg0: i32) -> (i32, i32) {
    %c0_i32 = arith.constant 0 : i32
    %c0_i32_0 = arith.constant 0 : i32
    return %arg0, %c0_i32 : i32, i32
  }
  func.func @transform_8(%arg0: i32) -> (i32, i32) {
    %c0_i32 = arith.constant 0 : i32
    %c0_i32_0 = arith.constant 0 : i32
    return %arg0, %c0_i32 : i32, i32
  }
}

</mosaic_0001>

<bundles_post_ra>
// kernel: tpu_custom_call.1
= control target key start
LH: loop header
LB: loop body
LE: loop exit
PB: predicated region body
PF: predicated region fallthrough
CT: control target
= control target key end

     0   :  { %14 = vsyncpa [#allocation3], 0  ;;  %s921_s0 = inlined_call_operand.hbm [shape: f32[8,128], index: 0, kind: input, shape index: {}]   ;;  %s922_s1 = inlined_call_operand.hbm [shape: bf16[128,128], index: 1, kind: input, shape index: {}]   ;;  %s923_s2 = inlined_call_operand.vmem [shape: f32[1,128], index: 2, kind: input, shape index: {}]   ;;  %s924_s3 = inlined_call_operand.hbm [shape: bf16[128,128], index: 3, kind: input, shape index: {}]   ;;  %s925_s4 = inlined_call_operand.vmem [shape: f32[1,128], index: 4, kind: input, shape index: {}]   ;;  %s926_s5 = inlined_call_operand.hbm [shape: bf16[128,128], index: 5, kind: input, shape index: {}]   ;;  %s927_s6 = inlined_call_operand.vmem [shape: f32[1,128], index: 6, kind: input, shape index: {}]   ;;  %s928_s7 = inlined_call_operand.hbm [shape: f32[8,128], index: 7, kind: output, shape index: {0}]   ;;  %s929_s8 = inlined_call_operand.hbm [shape: f32[8,128], index: 8, kind: output, shape index: {1}]  }
   0x1   :  { %15 = vsyncpa [#allocation6], 0 }
   0x2   :  { %16 = vsyncpa [#allocation9], 0 }
   0x3   :  { %17 = vsyncpa [#allocation4], 0 }
   0x4   :  { %18 = vsyncpa [#allocation12], 0  ;;  %s746_s27 = smov [#allocation5]   ;;  %s604_s9 = scalar_lea.hbm %s922_s1, 1024 }
   0x5   :  { %s34_s28 = sshll.u32 %s746_s27, 4  ;;  %p605_p0 = scmp.ne.s32.totalorder %s922_s1, %s604_s9  ;;  %s35_s28 = int_to_ptr.vmem [resolvable:$true] %s34_s28 }
   0x6   :  { %p608_p1 = scmp.lt.u32.totalorder %s604_s9, %s922_s1 }
   0x8   :  { %p610_p2 = pnand %p608_p1, %p605_p0 }
   0xa   :  { %613 = shalt.err (!%p610_p2)
}
   0xb   :  { %s614_s14 = scalar_lea.vmem %s35_s28, 1024  ;;  %p619_p4 = scmp.lt.s32.totalorder %s35_s28, %s35_s28 }
   0xc   :  { %p615_p3 = scmp.ne.s32.totalorder %s35_s28, %s614_s14  ;;  %p620_p5 = scmp.lt.s32.totalorder %s614_s14, %s614_s14 }
   0xe   :  { %p621_p6 = por %p620_p5, %p619_p4 }
  0x10   :  { %p622_p7 = pnand %p621_p6, %p615_p3 }
  0x12   :  { %625 = shalt.err (!%p622_p7)
}
  0x13   :  { %s747_s15 = smov 64   ;;  %s748_s16 = smov 4  }
  0x14   :  { %40 = dma.hbm_to_vmem [thread:$0]  %s922_s1, 1024, %s35_s28, [#allocation6], %s747_s15, %s747_s15, %s748_s16  }
  0x15   :  { %s749_s19 = smov [#allocation2]   ;;  %s750_s21 = smov [#allocation7]  }
  0x16   :  { %s25_s20 = sshll.u32 %s749_s19, 4  ;;  %s48_s22 = sshll.u32 %s750_s21, 4  ;;  %s26_s20 = int_to_ptr.vmem [resolvable:$true] %s25_s20  ;;  %s49_s22 = int_to_ptr.vmem [resolvable:$true] %s48_s22 }
  0x17   :  { %s626_s25 = scalar_lea.hbm %s921_s0, 128 }
  0x18   :  { %p627_p8 = scmp.ne.s32.totalorder %s921_s0, %s626_s25  ;;  %p630_p9 = scmp.lt.u32.totalorder %s626_s25, %s921_s0 }
  0x1a   :  { %p632_p10 = pnand %p630_p9, %p627_p8 }
  0x1c   :  { %635 = shalt.err (!%p632_p10)
}
  0x1d   :  { %s636_s1 = scalar_lea.vmem %s26_s20, 128  ;;  %p641_p12 = scmp.lt.s32.totalorder %s26_s20, %s26_s20 }
  0x1e   :  { %p637_p11 = scmp.ne.s32.totalorder %s26_s20, %s636_s1  ;;  %p642_p13 = scmp.lt.s32.totalorder %s636_s1, %s636_s1 }
  0x20   :  { %p643_p0 = por %p642_p13, %p641_p12 }
  0x22   :  { %p644_p1 = pnand %p643_p0, %p637_p11 }
  0x24   :  { %647 = shalt.err (!%p644_p1)
}
  0x25   :  { %28 = dma.hbm_to_vmem [thread:$0]  %s921_s0, 128, %s26_s20, [#allocation3]  }
  0x26   :  { %s648_s12 = scalar_lea.hbm %s924_s3, 1024 }
  0x27   :  { %p649_p2 = scmp.ne.s32.totalorder %s924_s3, %s648_s12  ;;  %p652_p3 = scmp.lt.u32.totalorder %s648_s12, %s924_s3 }
  0x29   :  { %p654_p4 = pnand %p652_p3, %p649_p2 }
  0x2b   :  { %657 = shalt.err (!%p654_p4)
}
  0x2c   :  { %s658_s19 = scalar_lea.vmem %s49_s22, 1024  ;;  %p663_p6 = scmp.lt.s32.totalorder %s49_s22, %s49_s22 }
  0x2d   :  { %p659_p5 = scmp.ne.s32.totalorder %s49_s22, %s658_s19  ;;  %p664_p7 = scmp.lt.s32.totalorder %s658_s19, %s658_s19 }
  0x2f   :  { %p665_p8 = por %p664_p7, %p663_p6 }
  0x31   :  { %p666_p9 = pnand %p665_p8, %p659_p5 }
  0x33   :  { %669 = shalt.err (!%p666_p9)
}
  0x34   :  { %54 = dma.hbm_to_vmem [thread:$0]  %s924_s3, 1024, %s49_s22, [#allocation6], %s747_s15, %s747_s15, %s748_s16  }
  0x35   :  { %s751_s21 = smov [#allocation8]   ;;  %s670_s26 = scalar_lea.hbm %s926_s5, 1024 }
  0x36   :  { %s62_s23 = sshll.u32 %s751_s21, 4  ;;  %p671_p10 = scmp.ne.s32.totalorder %s926_s5, %s670_s26  ;;  %s63_s23 = int_to_ptr.vmem [resolvable:$true] %s62_s23 }
  0x37   :  { %p674_p11 = scmp.lt.u32.totalorder %s670_s26, %s926_s5 }
  0x39   :  { %p676_p12 = pnand %p674_p11, %p671_p10 }
  0x3b   :  { %679 = shalt.err (!%p676_p12)
}
  0x3c   :  { %s680_s28 = scalar_lea.vmem %s63_s23, 1024  ;;  %p685_p0 = scmp.lt.s32.totalorder %s63_s23, %s63_s23 }
  0x3d   :  { %p681_p13 = scmp.ne.s32.totalorder %s63_s23, %s680_s28  ;;  %p686_p1 = scmp.lt.s32.totalorder %s680_s28, %s680_s28 }
  0x3f   :  { %p687_p2 = por %p686_p1, %p685_p0 }
  0x41   :  { %p688_p3 = pnand %p687_p2, %p681_p13 }
  0x43   :  { %691 = shalt.err (!%p688_p3)
}
  0x44   :  { %68 = dma.hbm_to_vmem [thread:$0]  %s926_s5, 1024, %s63_s23, [#allocation9], %s747_s15, %s747_s15, %s748_s16  }
  0x45   :  { %736 = dma.done.wait [#allocation3], 128  }
  0x46   :  { %737 = vsyncadd [#allocation3], 4294967168 }
  0x47   :  { %738 = dma.done.wait [#allocation6], 2048  }
  0x48   :  { %739 = vsyncadd [#allocation6], 4294965248 }
  0x49   :  { %740 = dma.done.wait [#allocation9], 1024  }
  0x4a   :  { %741 = vsyncadd [#allocation9], 4294966272  ;;  %v752_v0 = vmov 0.0   ;;  %vm753_vm0 = vmmov 0   ;;  %v580_v1 = vld [vmem:[#allocation5] sm:$0xff]   ;;  %v581_v2 = vld [vmem:[#allocation5 + $0x8] sm:$0xff]  }
  0x4b   :  { %510 = vmatprep.subr.bf16.mxu0 %v752_v0  ;;  %526 = vmatprep.mubr.msk.bf16.mxu0 %vm753_vm0, %v752_v0  ;;  %v582_v3 = vld [vmem:[#allocation5 + $0x10] sm:$0xff]   ;;  %v588_v4 = vld [vmem:[#allocation7] sm:$0xff]   ;;  %v583_v5 = vld [vmem:[#allocation5 + $0x18] sm:$0xff]  }
  0x4c   :  { %530 = vmatprep.subr.bf16.mxu1 %v752_v0  ;;  %546 = vmatprep.mubr.msk.bf16.mxu1 %vm753_vm0, %v752_v0  ;;  %v589_v6 = vld [vmem:[#allocation7 + $0x8] sm:$0xff]   ;;  %v584_v7 = vld [vmem:[#allocation5 + $0x20] sm:$0xff]   ;;  %v590_v8 = vld [vmem:[#allocation7 + $0x10] sm:$0xff]  }
  0x4d   :  { %511 = vmatpush3.bf16.msra.mxu0 %v580_v1  ;;  %531 = vmatpush3.bf16.msra.mxu1 %v588_v4  ;;  %v585_v9 = vld [vmem:[#allocation5 + $0x28] sm:$0xff]   ;;  %v591_v10 = vld [vmem:[#allocation7 + $0x18] sm:$0xff]   ;;  %v586_v11 = vld [vmem:[#allocation5 + $0x30] sm:$0xff]  }
  0x4e   :  { %512 = vmatprep.subr.bf16.mxu0 %v752_v0  ;;  %532 = vmatprep.subr.bf16.mxu1 %v752_v0  ;;  %v592_v12 = vld [vmem:[#allocation7 + $0x20] sm:$0xff]   ;;  %v587_v13 = vld [vmem:[#allocation5 + $0x38] sm:$0xff]   ;;  %v593_v15 = vld [vmem:[#allocation7 + $0x28] sm:$0xff]  }
  0x4f   :  { %v84_v14 = vld [vmem:[#allocation2] sm:$0xff]  ;;  %v594_v17 = vld [vmem:[#allocation7 + $0x30] sm:$0xff]   ;;  %v596_v19 = vld [vmem:[#allocation8] sm:$0xff]  }
  0x50   :  { %v85_v16 = vpack.c.bf16 %v84_v14, %v84_v14  ;;  %v595_v18 = vld [vmem:[#allocation7 + $0x38] sm:$0xff]   ;;  %v597_v20 = vld [vmem:[#allocation8 + $0x8] sm:$0xff]   ;;  %v598_v21 = vld [vmem:[#allocation8 + $0x10] sm:$0xff]  }
  0x51   :  { %513 = vmatpush3.bf16.msra.mxu0 %v581_v2  ;;  %533 = vmatpush3.bf16.msra.mxu1 %v589_v6  ;;  %v599_v22 = vld [vmem:[#allocation8 + $0x18] sm:$0xff]   ;;  %v600_v23 = vld [vmem:[#allocation8 + $0x20] sm:$0xff]   ;;  %v601_v24 = vld [vmem:[#allocation8 + $0x28] sm:$0xff]  }
  0x52   :  { %514 = vmatprep.subr.bf16.mxu0 %v752_v0  ;;  %534 = vmatprep.subr.bf16.mxu1 %v752_v0  ;;  %v456_v25 = vld [vmem:[%s923_s2] ss:$0 sm:$0xff]  ;;  %v602_v33 = vld [vmem:[#allocation8 + $0x30] sm:$0xff]   ;;  %s754_s2 = smov [#allocation10]  }
  0x53   :  { %v603_v34 = vld [vmem:[#allocation8 + $0x38] sm:$0xff]   ;;  %s431_s10 = sshll.u32 %s754_s2, 4  ;;  %s432_s10 = int_to_ptr.vmem [resolvable:$true] %s431_s10 }
  0x54   :  { %v465_v35 = vld [vmem:[%s925_s4] ss:$0 sm:$0xff]  ;;  %s692_s11 = scalar_lea.vmem %s432_s10, 128  ;;  %p697_p5 = scmp.lt.s32.totalorder %s432_s10, %s432_s10 }
  0x55   :  { %515 = vmatpush3.bf16.msra.mxu0 %v582_v3  ;;  %535 = vmatpush3.bf16.msra.mxu1 %v590_v8  ;;  %p693_p4 = scmp.ne.s32.totalorder %s432_s10, %s692_s11  ;;  %p698_p6 = scmp.lt.s32.totalorder %s692_s11, %s692_s11 }
  0x56   :  { %516 = vmatprep.subr.bf16.mxu0 %v752_v0  ;;  %536 = vmatprep.subr.bf16.mxu1 %v752_v0 }
  0x57   :  { %p699_p7 = por %p698_p6, %p697_p5 }
  0x59   :  { %517 = vmatpush3.bf16.msra.mxu0 %v583_v5  ;;  %537 = vmatpush3.bf16.msra.mxu1 %v591_v10  ;;  %p700_p8 = pnand %p699_p7, %p693_p4 }
  0x5a   :  { %518 = vmatprep.subr.bf16.mxu0 %v752_v0  ;;  %538 = vmatprep.subr.bf16.mxu1 %v752_v0 }
  0x5d   :  { %519 = vmatpush3.bf16.msra.mxu0 %v584_v7  ;;  %539 = vmatpush3.bf16.msra.mxu1 %v592_v12 }
  0x5e   :  { %520 = vmatprep.subr.bf16.mxu0 %v752_v0  ;;  %540 = vmatprep.subr.bf16.mxu1 %v752_v0 }
  0x61   :  { %521 = vmatpush3.bf16.msra.mxu0 %v585_v9  ;;  %541 = vmatpush3.bf16.msra.mxu1 %v593_v15 }
  0x62   :  { %522 = vmatprep.subr.bf16.mxu0 %v752_v0  ;;  %542 = vmatprep.subr.bf16.mxu1 %v752_v0 }
  0x65   :  { %523 = vmatpush3.bf16.msra.mxu0 %v586_v11  ;;  %543 = vmatpush3.bf16.msra.mxu1 %v594_v17 }
  0x66   :  { %524 = vmatprep.subr.bf16.mxu0 %v752_v0  ;;  %544 = vmatprep.subr.bf16.mxu1 %v752_v0 }
  0x69   :  { %525 = vmatpush3.bf16.msra.mxu0 %v587_v13  ;;  %545 = vmatpush3.bf16.msra.mxu1 %v595_v18 }
  0x6a   :  { %550 = vmatprep.subr.bf16.mxu0 %v752_v0 }
  0x6c   :  { %527 = vmatmul.mubr.bf16.vlgmr.msra.gmra.mrb[0].mxu0 %v85_v16 }
  0x6d   :  { %566 = vmatprep.mubr.msk.bf16.mxu0 %vm753_vm0, %v752_v0  ;;  %551 = vmatpush3.bf16.msra.mxu0 %v596_v19 }
  0x6e   :  { %552 = vmatprep.subr.bf16.mxu0 %v752_v0 }
  0x71   :  { %553 = vmatpush3.bf16.msra.mxu0 %v597_v20 }
  0x72   :  { %554 = vmatprep.subr.bf16.mxu0 %v752_v0 }
  0x75   :  { %555 = vmatpush3.bf16.msra.mxu0 %v598_v21 }
  0x76   :  { %556 = vmatprep.subr.bf16.mxu0 %v752_v0 }
  0x79   :  { %557 = vmatpush3.bf16.msra.mxu0 %v599_v22 }
  0x7a   :  { %558 = vmatprep.subr.bf16.mxu0 %v752_v0 }
  0x7d   :  { %559 = vmatpush3.bf16.msra.mxu0 %v600_v23 }
  0x7e   :  { %560 = vmatprep.subr.bf16.mxu0 %v752_v0 }
  0x81   :  { %561 = vmatpush3.bf16.msra.mxu0 %v601_v24 }
  0x82   :  { %562 = vmatprep.subr.bf16.mxu0 %v752_v0 }
  0x85   :  { %563 = vmatpush3.bf16.msra.mxu0 %v602_v33 }
  0x86   :  { %564 = vmatprep.subr.bf16.mxu0 %v752_v0 }
  0x89   :  { %565 = vmatpush3.bf16.msra.mxu0 %v603_v34 }
 0x13f   :  { %v191_v26 = vpop.f32.mrb[0].mxu0 }
 0x140   :  { %v192_v27 = vadd.f32 %v456_v25, %v191_v26  ;;  %v528_v28 = vpop.f32.mrb[1].mxu0 }
 0x141   :  { %v194_v29 = vpop.f32.mrb[2].mxu0 }
 0x142   :  { %v197_v30 = vmax.f32 %v192_v27, 0.0  ;;  %v529_v31 = vpop.f32.mrb[3].mxu0 }
 0x144   :  { %v198_v32 = vpack.c.bf16 %v197_v30, %v197_v30 }
 0x146   :  { %547 = vmatmul.mubr.bf16.vlgmr.msra.gmra.mrb[0].mxu1 %v198_v32 }
 0x219   :  { %v304_v36 = vpop.f32.mrb[0].mxu1 }
 0x21a   :  { %v305_v37 = vadd.f32 %v465_v35, %v304_v36  ;;  %v548_v38 = vpop.f32.mrb[1].mxu1 }
 0x21b   :  { %v307_v39 = vpop.f32.mrb[2].mxu1 }
 0x21c   :  { %v311_v40 = vmax.f32 %v305_v37, 0.0  ;;  %310 = vst [vmem:[#allocation10] sm:$0xff] %v305_v37  ;;  %v549_v41 = vpop.f32.mrb[3].mxu1 }
 0x21e   :  { %v312_v42 = vpack.c.bf16 %v311_v40, %v311_v40 }
 0x220   :  { %567 = vmatmul.mubr.bf16.vlgmr.msra.gmra.mrb[4].mxu0 %v312_v42 }
 0x221   :  { %703 = shalt.err (!%p700_p8)
}
 0x222   :  { %s704_s13 = scalar_lea.hbm %s928_s7, 128 }
 0x223   :  { %p705_p9 = scmp.ne.s32.totalorder %s928_s7, %s704_s13  ;;  %p708_p10 = scmp.lt.u32.totalorder %s704_s13, %s928_s7 }
 0x225   :  { %p710_p11 = pnand %p708_p10, %p705_p9 }
 0x227   :  { %713 = shalt.err (!%p710_p11)
}
 0x228   :  { %434 = dma.vmem_to_hbm [thread:$0]  %s432_s10, 128, %s928_s7, [#allocation4]   ;;  %v474_v43 = vld [vmem:[%s927_s6] ss:$0 sm:$0xff] }
 0x229   :  { %s755_s24 = smov [#allocation11]  }
 0x22a   :  { %s441_s25 = sshll.u32 %s755_s24, 4  ;;  %s442_s25 = int_to_ptr.vmem [resolvable:$true] %s441_s25 }
 0x22b   :  { %s714_s26 = scalar_lea.vmem %s442_s25, 128  ;;  %p719_p13 = scmp.lt.s32.totalorder %s442_s25, %s442_s25 }
 0x22c   :  { %p715_p12 = scmp.ne.s32.totalorder %s442_s25, %s714_s26  ;;  %p720_p0 = scmp.lt.s32.totalorder %s714_s26, %s714_s26 }
 0x22e   :  { %p721_p1 = por %p720_p0, %p719_p13 }
 0x230   :  { %p722_p2 = pnand %p721_p1, %p715_p12 }
 0x2f3   :  { %v418_v44 = vpop.f32.mrb[4].mxu0 }
 0x2f4   :  { %v419_v45 = vadd.f32 %v474_v43, %v418_v44  ;;  %v568_v46 = vpop.f32.mrb[5].mxu0 }
 0x2f5   :  { %v421_v47 = vpop.f32.mrb[6].mxu0 }
 0x2f6   :  { %424 = vst [vmem:[#allocation11] sm:$0xff] %v419_v45  ;;  %v569_v48 = vpop.f32.mrb[7].mxu0 }
 0x2f7   :  { %725 = shalt.err (!%p722_p2)
}
 0x2f8   :  { %s726_s6 = scalar_lea.hbm %s929_s8, 128 }
 0x2f9   :  { %p727_p3 = scmp.ne.s32.totalorder %s929_s8, %s726_s6  ;;  %p730_p4 = scmp.lt.u32.totalorder %s726_s6, %s929_s8 }
 0x2fb   :  { %p732_p5 = pnand %p730_p4, %p727_p3 }
 0x2fd   :  { %735 = shalt.err (!%p732_p5)
}
 0x2fe   :  { %444 = dma.vmem_to_hbm [thread:$0]  %s442_s25, 128, %s929_s8, [#allocation12]  }
 0x2ff   :  { %742 = dma.done.wait [#allocation4], 128  }
 0x300   :  { %743 = vsyncadd [#allocation4], 4294967168 }
 0x301   :  { %744 = dma.done.wait [#allocation12], 128  }
 0x302   :  { %745 = vsyncadd [#allocation12], 4294967168 }
 0x303   :  { %451 = vsyncpa [#allocation3], 1 }
 0x304   :  { %452 = vsyncpa [#allocation6], 1 }
 0x305   :  { %453 = vsyncpa [#allocation9], 1 }
 0x306   :  { %454 = vsyncpa [#allocation4], 1 }
 0x307   :  { %455 = vsyncpa [#allocation12], 1 }

</bundles_post_ra>
